<compile_context>
chip_gen: v7x
topology: tpu7x:2x2x1
jax: 0.10.0
libtpu: 0.0.40
codegen_flags: <defaults>
</compile_context>

<pallas_src>
import math

import jax
import jax.numpy as jnp
from jax import lax
from jax.experimental import pallas as pl
from jax.experimental.pallas import tpu as pltpu


# ----------------------------------------------------------------------------
# Hardware queries (guarded — never allowed to break compilation)
# ----------------------------------------------------------------------------
def _vmem_capacity_bytes() -> int:
    try:
        cap = getattr(pltpu.get_tpu_info(), "vmem_capacity_bytes", None)
        if cap:
            return int(cap)
    except Exception:
        pass
    return 64 * 1024 * 1024  # conservative (v7x-sized) fallback


def _vmem_limit_bytes() -> int:
    cap = _vmem_capacity_bytes()
    return int(max(32 << 20, min(cap * 3 // 4, 96 << 20)))


def _num_tensorcores() -> int:
    try:
        info = pltpu.get_tpu_info()
        for attr in ("num_cores", "core_count", "num_tensorcores"):
            v = getattr(info, attr, None)
            if v:
                return max(1, int(v))
    except Exception:
        pass
    try:
        kind = jax.devices()[0].device_kind.lower()
        if "v7" in kind or "7x" in kind:
            return 2
    except Exception:
        pass
    return 1


# ----------------------------------------------------------------------------
# Block planning
# ----------------------------------------------------------------------------
def _plan_blocks(B, L, out_rows, n_feat, x_itemsize, out_itemsize, resident_bytes):
    """Pick batches-per-grid-step (bblk) and whether the flattened (B*T, F)
    output layout is usable. The kernel is HBM-bandwidth bound, so the per-step
    x block should be multi-MiB while keeping >=2 grid steps per TensorCore."""
    vmem_limit = _vmem_limit_bytes()
    # Double-buffered x + out blocks must fit alongside the (double-buffered,
    # constant-index) weight/bias blocks and compiler scratch.
    budget = max(int(vmem_limit * 0.6) - 2 * resident_bytes, 4 << 20)
    per_batch = 2 * n_feat * (L * x_itemsize + out_rows * out_itemsize)
    bblk = max(1, budget // per_batch)
    # DMA efficiency plateaus at a few MiB; cap the x block around 8 MiB.
    bblk = min(bblk, max(1, (8 << 20) // max(1, L * n_feat * x_itemsize)))
    bblk = min(bblk, B)
    # Keep >=2 grid steps per TensorCore (prefetch/compute overlap; both v7x TCs
    # get work) — but no more, since fewer/larger DMAs win on 1-TC v5e/v6e.
    min_steps = 2 * _num_tensorcores()
    if B >= min_steps:
        bblk = min(bblk, pl.cdiv(B, min_steps))
    bblk = max(1, bblk)

    # Flattened (B*T, F) output blocks need the second-minor block dim
    # (bblk * out_rows) to be a sublane-pack multiple; nudge bblk to satisfy it.
    sub = max(8, 32 // out_itemsize)              # 8 (f32) / 16 (bf16) / 32 (int8)
    m = sub // math.gcd(out_rows, sub)
    flat_bblk = (bblk // m) * m if bblk >= m else m
    if flat_bblk <= B and flat_bblk * per_batch <= int(vmem_limit * 0.7):
        return flat_bblk, True
    return bblk, False                             # fallback: 3-D output blocks


# ----------------------------------------------------------------------------
# Kernels
# ----------------------------------------------------------------------------
def _store_rows(o_ref, i, y):
    """Store one batch-slice result.

    o_ref is either the flattened (bblk*T, F) block (dense lane/sublane-packed
    writeback) or a (bblk, T, F) block (fallback layout)."""
    rows = y.shape[0]
    y = y.astype(o_ref.dtype)
    if len(o_ref.shape) == 2:
        start = i * rows
        if rows % 8 == 0:
            start = pl.multiple_of(start, 8)
        o_ref[pl.ds(start, rows), :] = y
    else:
        o_ref[i] = y


def _linear_proj_kernel(x_ref, w_ref, b_ref, o_ref):
    # x_ref: (bblk, L, F)   w_ref: (T, L) f32   b_ref: (T, 1) f32
    # o_ref: (bblk*T, F) or (bblk, T, F)
    n_feat = x_ref.shape[-1]
    w = w_ref[...]
    # Hoisted bias broadcast (JAX does not CSE broadcast_in_dim inside loops).
    b_full = jnp.broadcast_to(b_ref[...], (w.shape[0], n_feat))
    bblk = x_ref.shape[0]

    def body(i, carry):
        xi = x_ref[i].astype(jnp.float32)
        y = jnp.dot(w, xi, preferred_element_type=jnp.float32) + b_full
        _store_rows(o_ref, i, y)
        return carry

    lax.fori_loop(0, bblk, body, 0, unroll=min(bblk, 8))


def _mlp_proj_kernel(x_ref, w1_ref, b1_ref, w2_ref, b2_ref, o_ref):
    # x_ref: (bblk, L, F)  w1: (H, L)  b1: (H, 1)  w2: (T, H)  b2: (T, 1)
    n_feat = x_ref.shape[-1]
    w1 = w1_ref[...]
    w2 = w2_ref[...]
    b1_full = jnp.broadcast_to(b1_ref[...], (w1.shape[0], n_feat))
    b2_full = jnp.broadcast_to(b2_ref[...], (w2.shape[0], n_feat))
    bblk = x_ref.shape[0]

    def body(i, carry):
        xi = x_ref[i].astype(jnp.float32)
        h = jnp.dot(w1, xi, preferred_element_type=jnp.float32) + b1_full
        h = jnp.maximum(h, 0.0)                                    # ReLU (f32)
        y = jnp.dot(w2, h, preferred_element_type=jnp.float32) + b2_full
        _store_rows(o_ref, i, y)
        return carry

    lax.fori_loop(0, bblk, body, 0, unroll=min(bblk, 8))


# ----------------------------------------------------------------------------
# Shared pallas_call wrapper
# ----------------------------------------------------------------------------
def _run_projection(kernel, x, params, out_rows, flops):
    B, L, n_feat = x.shape
    out_dtype = x.dtype
    x_itemsize = jnp.dtype(x.dtype).itemsize
    out_itemsize = jnp.dtype(out_dtype).itemsize
    resident_bytes = sum(int(p.size) * jnp.dtype(p.dtype).itemsize for p in params)

    bblk, use_flat = _plan_blocks(B, L, out_rows, n_feat,
                                  x_itemsize, out_itemsize, resident_bytes)
    steps = pl.cdiv(B, bblk)   # no divisor-of-B requirement; tail block is clamped

    x_spec = pl.BlockSpec((bblk, L, n_feat), lambda i: (i, 0, 0))
    param_specs = [pl.BlockSpec(p.shape, lambda i: (0, 0)) for p in params]

    if use_flat:
        out_shape = jax.ShapeDtypeStruct((B * out_rows, n_feat), out_dtype)
        out_spec = pl.BlockSpec((bblk * out_rows, n_feat), lambda i: (i, 0))
    else:
        out_shape = jax.ShapeDtypeStruct((B, out_rows, n_feat), out_dtype)
        out_spec = pl.BlockSpec((bblk, out_rows, n_feat), lambda i: (i, 0, 0))

    cost = pl.CostEstimate(
        flops=int(flops),
        transcendentals=0,
        bytes_accessed=int(B * L * n_feat * x_itemsize
                           + B * out_rows * n_feat * out_itemsize
                           + resident_bytes),
    )

    y = pl.pallas_call(
        kernel,
        out_shape=out_shape,
        grid_spec=pltpu.PrefetchScalarGridSpec(
            num_scalar_prefetch=0,
            grid=(steps,),
            in_specs=[x_spec] + param_specs,
            out_specs=out_spec,
        ),
        compiler_params=pltpu.CompilerParams(
            dimension_semantics=("parallel",),
            vmem_limit_bytes=_vmem_limit_bytes(),
        ),
        cost_estimate=cost,
    )(x, *params)

    if use_flat:
        y = y.reshape(B, out_rows, n_feat)   # row-major: free metadata reshape
    return y


# ----------------------------------------------------------------------------
# Public wrappers (match TemporalProjection.forward)
# ----------------------------------------------------------------------------
def temporal_projection_linear(x, w, b):
    """hidden_size=None path. x: [B, L, F], w: [T, L], b: [T] -> [B, T, F]."""
    B, L, F_ = x.shape
    T = w.shape[0]
    w32 = jnp.asarray(w, jnp.float32)
    b32 = jnp.asarray(b, jnp.float32).reshape(T, 1)
    flops = 2 * B * T * L * F_
    return _run_projection(_linear_proj_kernel, x, (w32, b32), T, flops)


def temporal_projection_mlp(x, w1, b1, w2, b2):
    """hidden_size=H path. x: [B, L, F], w1: [H, L], b1: [H], w2: [T, H], b2: [T]."""
    B, L, F_ = x.shape
    H = w1.shape[0]
    T = w2.shape[0]
    w1_ = jnp.asarray(w1, jnp.float32)
    b1_ = jnp.asarray(b1, jnp.float32).reshape(H, 1)
    w2_ = jnp.asarray(w2, jnp.float32)
    b2_ = jnp.asarray(b2, jnp.float32).reshape(T, 1)
    flops = 2 * B * F_ * (H * L + T * H)
    return _run_projection(_mlp_proj_kernel, x, (w1_, b1_, w2_, b2_), T, flops)


# ----------------------------------------------------------------------------
# Pure-JAX references (match PyTorch semantics exactly)
# ----------------------------------------------------------------------------
def _ref_linear(x, w, b):
    return jnp.einsum("blf,tl->btf", x, w) + b[None, :, None]


def _ref_mlp(x, w1, b1, w2, b2):
    h = jnp.einsum("blf,hl->bhf", x, w1) + b1[None, :, None]
    h = jnp.maximum(h, 0.0)
    return jnp.einsum("bhf,th->btf", h, w2) + b2[None, :, None]


# ----------------------------------------------------------------------------
# Deterministic init (mimics nn.Linear: U(-1/sqrt(fan_in), 1/sqrt(fan_in)))
# ----------------------------------------------------------------------------
def _init_linear(key, out_features, in_features, dtype=jnp.float32):
    kw, kb = jax.random.split(key)
    bound = 1.0 / jnp.sqrt(float(in_features))
    w = jax.random.uniform(kw, (out_features, in_features), dtype, -bound, bound)
    b = jax.random.uniform(kb, (out_features,), dtype, -bound, bound)
    return w, b


if __name__ == "__main__":
    # Small shapes consistent with forward: x is [B, input_len, feature_dim]
    B, L, T, F_, H = 8, 16, 8, 128, 32

    key = jax.random.PRNGKey(0)
    kx, k1, k2, k3 = jax.random.split(key, 4)
    x = jax.random.normal(kx, (B, L, F_), jnp.float32)

    w, b = _init_linear(k1, T, L)          # hidden_size=None path
    w1, b1 = _init_linear(k2, H, L)        # hidden_size=H path
    w2, b2 = _init_linear(k3, T, H)

    # --- f32 path (exact PyTorch semantics) -----------------------------------
    y_lin = temporal_projection_linear(x, w, b)
    jax.block_until_ready(y_lin)
    assert y_lin.shape == (B, T, F_)
    assert jnp.allclose(y_lin, _ref_linear(x, w, b), atol=1e-4, rtol=1e-4)

    y_mlp = temporal_projection_mlp(x, w1, b1, w2, b2)
    jax.block_until_ready(y_mlp)
    assert y_mlp.shape == (B, T, F_)
    assert jnp.allclose(y_mlp, _ref_mlp(x, w1, b1, w2, b2), atol=1e-4, rtol=1e-4)

    # --- bf16 activations (HBM-bound -> ~2x fewer bytes); weights & compute f32,
    #     only the final store rounds to bf16 -----------------------------------
    xb = x.astype(jnp.bfloat16)
    xb_f32 = xb.astype(jnp.float32)

    y_lin_bf16 = temporal_projection_linear(xb, w, b)
    jax.block_until_ready(y_lin_bf16)
    assert y_lin_bf16.dtype == jnp.bfloat16
    assert jnp.allclose(y_lin_bf16.astype(jnp.float32), _ref_linear(xb_f32, w, b),
                        atol=5e-2, rtol=5e-2)

    y_mlp_bf16 = temporal_projection_mlp(xb, w1, b1, w2, b2)
    jax.block_until_ready(y_mlp_bf16)
    assert jnp.allclose(y_mlp_bf16.astype(jnp.float32), _ref_mlp(xb_f32, w1, b1, w2, b2),
                        atol=5e-2, rtol=5e-2)

    # --- batch not divisible by the chosen block: cdiv grid + clamped tail -----
    x_odd = jax.random.normal(kx, (B + 3, L, F_), jnp.float32)
    y_odd = temporal_projection_linear(x_odd, w, b)
    jax.block_until_ready(y_odd)
    assert y_odd.shape == (B + 3, T, F_)
    assert jnp.allclose(y_odd, _ref_linear(x_odd, w, b), atol=1e-4, rtol=1e-4)

    print("KERNEL_OK")
</pallas_src>

<mosaic_0001>
module attributes {stable_mosaic.version = 11 : i64} {
  func.func @_linear_proj_kernel(%arg0: i32, %arg1: memref<4x16x128xf32, #tpu.memory_space<vmem>>, %arg2: memref<8x16xf32, #tpu.memory_space<vmem>>, %arg3: memref<8x1xf32, #tpu.memory_space<vmem>>, %arg4: memref<32x128xf32, #tpu.memory_space<vmem>>) attributes {dimension_semantics = [#tpu.dimension_semantics<parallel>], iteration_bounds = array<i64: 2>, scalar_prefetch = 0 : i64, scratch_operands = 0 : i64, tpu.core_type = #tpu.core_type<tc>, window_params = [{transform_indices = @transform_0, window_bounds = array<i64: 4, 16, 128>}, {pipeline_mode = #tpu.pipeline_mode<synchronous>, transform_indices = @transform_1, window_bounds = array<i64: 8, 16>}, {pipeline_mode = #tpu.pipeline_mode<synchronous>, transform_indices = @transform_2, window_bounds = array<i64: 8, 1>}, {transform_indices = @transform_3, window_bounds = array<i64: 32, 128>}]} {
    %c0 = arith.constant 0 : index
    %c0_0 = arith.constant 0 : index
    %0 = vector.load %arg2[%c0, %c0_0] : memref<8x16xf32, #tpu.memory_space<vmem>>, vector<8x16xf32>
    %c0_1 = arith.constant 0 : index
    %c0_2 = arith.constant 0 : index
    %1 = vector.load %arg3[%c0_1, %c0_2] : memref<8x1xf32, #tpu.memory_space<vmem>>, vector<8x1xf32>
    %2 = vector.shape_cast %1 : vector<8x1xf32> to vector<8x1xf32>
    %3 = vector.broadcast %2 : vector<8x1xf32> to vector<8x128xf32>
    %c0_i32 = arith.constant 0 : i32
    %4 = arith.index_cast %c0_i32 : i32 to index
    %c0_3 = arith.constant 0 : index
    %c0_4 = arith.constant 0 : index
    %5 = vector.load %arg1[%4, %c0_3, %c0_4] : memref<4x16x128xf32, #tpu.memory_space<vmem>>, vector<1x16x128xf32>
    %6 = vector.shape_cast %5 : vector<1x16x128xf32> to vector<16x128xf32>
    %cst = arith.constant dense<0.000000e+00> : vector<8x128xf32>
    %7 = tpu.matmul %0, %6, %cst {dimension_numbers = #tpu.dot_dimension_numbers<[1], [0], [0], [1], [0, 0, 1, 1], [], []>} : vector<8x16xf32>, vector<16x128xf32>, vector<8x128xf32> -> vector<8x128xf32>
    %8 = arith.addf %7, %3 : vector<8x128xf32>
    %c8_i32 = arith.constant 8 : i32
    %9 = arith.muli %c0_i32, %c8_i32 : i32
    %10 = tpu.assume_multiple %9, 8 : i32
    %11 = arith.index_cast %10 : i32 to index
    %c0_5 = arith.constant 0 : index
    %12 = vector.load %arg4[%11, %c0_5] : memref<32x128xf32, #tpu.memory_space<vmem>>, vector<8x128xf32>
    tpu.vector_store %arg4[%11, %c0_5], %8 {strides = array<i32>} : memref<32x128xf32, #tpu.memory_space<vmem>>, vector<8x128xf32>,
    %c1_i32 = arith.constant 1 : i32
    %13 = arith.index_cast %c1_i32 : i32 to index
    %c0_6 = arith.constant 0 : index
    %c0_7 = arith.constant 0 : index
    %14 = vector.load %arg1[%13, %c0_6, %c0_7] : memref<4x16x128xf32, #tpu.memory_space<vmem>>, vector<1x16x128xf32>
    %15 = vector.shape_cast %14 : vector<1x16x128xf32> to vector<16x128xf32>
    %cst_8 = arith.constant dense<0.000000e+00> : vector<8x128xf32>
    %16 = tpu.matmul %0, %15, %cst_8 {dimension_numbers = #tpu.dot_dimension_numbers<[1], [0], [0], [1], [0, 0, 1, 1], [], []>} : vector<8x16xf32>, vector<16x128xf32>, vector<8x128xf32> -> vector<8x128xf32>
    %17 = arith.addf %16, %3 : vector<8x128xf32>
    %c8_i32_9 = arith.constant 8 : i32
    %18 = arith.muli %c1_i32, %c8_i32_9 : i32
    %19 = tpu.assume_multiple %18, 8 : i32
    %20 = arith.index_cast %19 : i32 to index
    %c0_10 = arith.constant 0 : index
    %21 = vector.load %arg4[%20, %c0_10] : memref<32x128xf32, #tpu.memory_space<vmem>>, vector<8x128xf32>
    tpu.vector_store %arg4[%20, %c0_10], %17 {strides = array<i32>} : memref<32x128xf32, #tpu.memory_space<vmem>>, vector<8x128xf32>,
    %c2_i32 = arith.constant 2 : i32
    %22 = arith.index_cast %c2_i32 : i32 to index
    %c0_11 = arith.constant 0 : index
    %c0_12 = arith.constant 0 : index
    %23 = vector.load %arg1[%22, %c0_11, %c0_12] : memref<4x16x128xf32, #tpu.memory_space<vmem>>, vector<1x16x128xf32>
    %24 = vector.shape_cast %23 : vector<1x16x128xf32> to vector<16x128xf32>
    %cst_13 = arith.constant dense<0.000000e+00> : vector<8x128xf32>
    %25 = tpu.matmul %0, %24, %cst_13 {dimension_numbers = #tpu.dot_dimension_numbers<[1], [0], [0], [1], [0, 0, 1, 1], [], []>} : vector<8x16xf32>, vector<16x128xf32>, vector<8x128xf32> -> vector<8x128xf32>
    %26 = arith.addf %25, %3 : vector<8x128xf32>
    %c8_i32_14 = arith.constant 8 : i32
    %27 = arith.muli %c2_i32, %c8_i32_14 : i32
    %28 = tpu.assume_multiple %27, 8 : i32
    %29 = arith.index_cast %28 : i32 to index
    %c0_15 = arith.constant 0 : index
    %30 = vector.load %arg4[%29, %c0_15] : memref<32x128xf32, #tpu.memory_space<vmem>>, vector<8x128xf32>
    tpu.vector_store %arg4[%29, %c0_15], %26 {strides = array<i32>} : memref<32x128xf32, #tpu.memory_space<vmem>>, vector<8x128xf32>,
    %c3_i32 = arith.constant 3 : i32
    %31 = arith.index_cast %c3_i32 : i32 to index
    %c0_16 = arith.constant 0 : index
    %c0_17 = arith.constant 0 : index
    %32 = vector.load %arg1[%31, %c0_16, %c0_17] : memref<4x16x128xf32, #tpu.memory_space<vmem>>, vector<1x16x128xf32>
    %33 = vector.shape_cast %32 : vector<1x16x128xf32> to vector<16x128xf32>
    %cst_18 = arith.constant dense<0.000000e+00> : vector<8x128xf32>
    %34 = tpu.matmul %0, %33, %cst_18 {dimension_numbers = #tpu.dot_dimension_numbers<[1], [0], [0], [1], [0, 0, 1, 1], [], []>} : vector<8x16xf32>, vector<16x128xf32>, vector<8x128xf32> -> vector<8x128xf32>
    %35 = arith.addf %34, %3 : vector<8x128xf32>
    %c8_i32_19 = arith.constant 8 : i32
    %36 = arith.muli %c3_i32, %c8_i32_19 : i32
    %37 = tpu.assume_multiple %36, 8 : i32
    %38 = arith.index_cast %37 : i32 to index
    %c0_20 = arith.constant 0 : index
    %39 = vector.load %arg4[%38, %c0_20] : memref<32x128xf32, #tpu.memory_space<vmem>>, vector<8x128xf32>
    tpu.vector_store %arg4[%38, %c0_20], %35 {strides = array<i32>} : memref<32x128xf32, #tpu.memory_space<vmem>>, vector<8x128xf32>,
    %c4_i32 = arith.constant 4 : i32
    return
  }
  func.func @transform_0(%arg0: i32) -> (i32, i32, i32) {
    %c0_i32 = arith.constant 0 : i32
    %c0_i32_0 = arith.constant 0 : i32
    %c0_i32_1 = arith.constant 0 : i32
    return %arg0, %c0_i32, %c0_i32_0 : i32, i32, i32
  }
  func.func @transform_1(%arg0: i32) -> (i32, i32) {
    %c0_i32 = arith.constant 0 : i32
    %c0_i32_0 = arith.constant 0 : i32
    %c0_i32_1 = arith.constant 0 : i32
    return %c0_i32, %c0_i32_0 : i32, i32
  }
  func.func @transform_2(%arg0: i32) -> (i32, i32) {
    %c0_i32 = arith.constant 0 : i32
    %c0_i32_0 = arith.constant 0 : i32
    %c0_i32_1 = arith.constant 0 : i32
    return %c0_i32, %c0_i32_0 : i32, i32
  }
  func.func @transform_3(%arg0: i32) -> (i32, i32) {
    %c0_i32 = arith.constant 0 : i32
    %c0_i32_0 = arith.constant 0 : i32
    return %arg0, %c0_i32 : i32, i32
  }
}

</mosaic_0001>

<bundles_post_ra>
// kernel: tpu_custom_call.1
= control target key start
LH: loop header
LB: loop body
LE: loop exit
PB: predicated region body
PF: predicated region fallthrough
CT: control target
= control target key end

     0   :  { %8 = vsyncpa [#allocation3], 0  ;;  %s1027_s0 = inlined_call_operand.hbm [shape: f32[8,16,128], index: 0, kind: input, shape index: {}]   ;;  %s1028_s1 = inlined_call_operand.vmem [shape: f32[8,16], index: 1, kind: input, shape index: {}]   ;;  %s1029_s2 = inlined_call_operand.vmem [shape: f32[8,1], index: 2, kind: input, shape index: {}]   ;;  %s1030_s3 = inlined_call_operand.hbm [shape: f32[64,128], index: 3, kind: output, shape index: {}]  }
   0x1   :  { %10 = vsyncpa [#allocation3 + $0x1], 0 }
   0x2   :  { %11 = vsyncpa [#allocation4], 0 }
   0x3   :  { %13 = vsyncpa [#allocation4 + $0x1], 0  ;;  %s854_s12 = smov 0   ;;  %s856_s13 = smov 0  }
   0x4   :  { %s858_s14 = smov 0   ;;  %s860_s15 = smov 0  }
   0x5 LB: > { %s875_s16 = sadd.s32 4294967295, %s822_s15   ;;  %s588_s17 = sadd.s32 4294967294, %s822_s15   ;;  %s822_s15 = sphi %s860_s15, %s1043_s15   ;;  %s818_s14 = sphi %s858_s14, %s1042_s14   ;;  %s814_s13 = sphi %s856_s13, %s1041_s13   ;;  %s810_s12 = sphi %s854_s12, %s1040_s12  }
   0x6   : > { %s879_s18 = sadd.s32 1, %s822_s15   ;;  %s26_s19 = sadd.s32 1, %s818_s14 }
   0x7   : > { %s23_s20 = ssub.s32 %s822_s15, %s879_s18  ;;  %p33_p0 = scmp.ne.s32.totalorder %s818_s14, %s814_s13 }
   0x8   : > { %p24_p1 = scmp.eq.s32.totalorder %s23_s20, 0  ;;  %p34_p2 = scmp.eq.s32.totalorder %s822_s15, 0 }
   0x9   : > { %p39_p3 = scmp.ne.s32.totalorder %s814_s13, %s810_s12  ;;  %p40_p4 = scmp.eq.s32.totalorder %s875_s16, 0 }
   0xa   : > { %s891_s21 = scalar_select %p24_p1, %s818_s14, %s26_s19  }
   0xb   : > { %p893_p5 = por %p34_p2, %p33_p0  ;;  %p897_p6 = por %p40_p4, %p39_p3 }
   0xc   : > { %p105_p7 = scmp.eq.s32.totalorder %s875_s16, 1  ;;  %p111_p8 = scmp.eq.s32.totalorder %s588_s17, 1 }
   0xd   : > { %p683_p10 = scmp.lt.s32.totalorder %s822_s15, 2  ;;  %s137_s26 = sand.u32 1, %s818_s14  }
   0xe   : > { %p904_p11 = por %p105_p7, %p33_p0  ;;  %p908_p12 = por %p111_p8, %p39_p3 }
   0xf   : > { %s617_s27 = sshll.u32 %s822_s15, 10  ;;  %s591_s28 = sshll.u32 %s137_s26, 6 }
  0x10   : > { %s1034_s24 = scalar_select %p904_p11, 1, 0 }
  0x11   : > { %s1035_s25 = scalar_select %p908_p12, 1, 0 }
  0x12   : > { %s917_s4 = scalar_lea.hbm %s1027_s0, %s617_s27  ;;  %s141_s5 = scalar_lea.vmem [#allocation2], %s591_s28 }
  0x13   : > { %s149_s6 = sshll.u32 %s141_s5, 4  ;;  %p921_p13 = pnand %p683_p10, %p893_p5  ;;  %s925_s6 = int_to_ptr.vmem [resolvable:$true] %s149_s6 }
  0x14   : > { %s927_s8 = scalar_lea.sflag [#allocation3], %s137_s26  ;;  %s726_s9 = scalar_lea.hbm %s917_s4, 1024 }
  0x15   : > { %p727_p0 = scmp.ne.s32.totalorder %s917_s4, %s726_s9  ;;  %p728_p1 = pneg %p921_p13 }
  0x16   : > { %s731_s17 = scalar_lea.hbm %s1027_s0, 2048  ;;  %p732_p4 = scmp.lt.u32.totalorder %s917_s4, %s1027_s0 }
  0x17   : > { %p729_p2 = pnand %p728_p1, %p727_p0  ;;  %p733_p5 = scmp.lt.u32.totalorder %s731_s17, %s726_s9 }
  0x18   : > { %p735_p8 = scmp.lt.u32.totalorder %s726_s9, %s917_s4 }
  0x19   : > { %p730_p3 = pneg %p729_p2  ;;  %p734_p7 = por %p733_p5, %p732_p4 }
  0x1b   : > { %p736_p10 = por %p735_p8, %p734_p7 }
  0x1d   : > { %p737_p9 = pnand %p736_p10, %p730_p3 }
  0x1f   : > { %740 = shalt.err (!%p737_p9)
}
  0x20   : > { %s741_s22 = scalar_lea.vmem %s925_s6, 1024  ;;  %s824_s26 = smov [#allocation2]  }
  0x21   : > { %p742_p0 = scmp.ne.s32.totalorder %s925_s6, %s741_s22  ;;  %s746_s27 = sshll.u32 %s824_s26, 4  ;;  %s747_s27 = int_to_ptr.vmem [resolvable:$false] %s746_s27 }
  0x22   : > { %s748_s28 = scalar_lea.vmem %s747_s27, 2048  ;;  %p749_p11 = scmp.lt.s32.totalorder %s925_s6, %s747_s27 }
  0x23   : > { %p744_p2 = pnand %p742_p0, %p728_p1  ;;  %p750_p4 = scmp.lt.s32.totalorder %s748_s28, %s741_s22 }
  0x25   : > { %p745_p12 = pneg %p744_p2  ;;  %p751_p5 = por %p750_p4, %p749_p11 }
  0x27   : > { %p752_p7 = pnand %p751_p5, %p745_p12 }
  0x29   : > { %755 = shalt.err (!%p752_p7)
}
  0x2a   : > { %s825_s29 = smov 128   ;;  %s826_s30 = smov 8  }
  0x2b   : > { %678 = dma.hbm_to_vmem [thread:$0]  (!%p921_p13), %s917_s4, 1024, %s925_s6, %s927_s8, %s825_s29, %s825_s29, %s826_s30  }
  0x2c   : > { %p595_p9 = scmp.ge.s32.totalorder %s822_s15, 1  ;;  %p157_p1 = scmp.lt.s32.totalorder %s822_s15, 3 }
  0x2e   : > { %p158_p3 = pnand %p595_p9, %p157_p1 }
  0x2f   : > { %s958_s5 = sand.u32 (!%p158_p3), 1, %s814_s13  }
  0x30   : > { %161 = sbr.rel (%p158_p3) target bundleno = 296 (0x128), region = 32  ;;  %s596_s9 = sshll.u32 (!%p158_p3), %s958_s5, 6 }
  0x31   : > { %s164_s10 = scalar_lea.sflag (!%p158_p3), [#allocation3], %s958_s5  ;;  %s167_s11 = scalar_lea.vmem (!%p158_p3), [#allocation2], %s596_s9 }
  0x37   : > { %801 = dma.done.wait (%p897_p6), %s164_s10, 1024  }
  0x38   : > { %803 = vsyncadd (%p897_p6), %s164_s10, 4294966272  ;;  %v827_v0 = vmov 0.0|0.0   ;;  %vm828_vm0 = vmmov 0   ;;  %v829_v1 = vmov 0.0   ;;  %v830_v2 = vmov 0   ;;  %v199_v3 = vld [vmem:[%s167_s11] sm:$0xff] }
  0x39   : > { %659 = vmatprep.subr.bf16.mxu0 %v827_v0  ;;  %662 = vmatprep.subr.bf16.mxu1 %v827_v0  ;;  %v200_v4 = vld [vmem:[%s167_s11 + $0x8] sm:$0xff]  ;;  %v599_v5 = vld [vmem:[%s167_s11 + $0x10] sm:$0xff]  ;;  %v600_v7 = vld [vmem:[%s167_s11 + $0x18] sm:$0xff]  ;;  %vm201_vm1 = vcmask 130048   ;;  %s597_s8 = sshll.u32 %s958_s5, 5  ;;  %s618_s20 = sshll.u32 %s875_s16, 9 }
  0x3a   : > { %635 = vmatprep.mubr.msk.f32.mxu0 %vm828_vm0, %v829_v1  ;;  %642 = vmatprep.mubr.msk.f32.mxu1 %vm828_vm0, %v829_v1  ;;  %v660_v6 = vpack.c.bf16 %v200_v4, %v199_v3  ;;  %v603_v8 = vld [vmem:[%s167_s11 + $0x20] sm:$0xff]  ;;  %v663_v9 = vpack.c.bf16 %v600_v7, %v599_v5  ;;  %v604_v10 = vld [vmem:[%s167_s11 + $0x28] sm:$0xff]  ;;  %v607_v11 = vld [vmem:[%s167_s11 + $0x30] sm:$0xff]  ;;  %s189_s17 = scalar_lea.vmem [#allocation5], %s597_s8  ;;  %s983_s27 = scalar_lea.hbm %s1030_s3, %s618_s20 }
  0x3b   : > { %725 = vset.pattern.permute.xlu0 %v830_v2  ;;  %v608_v12 = vld [vmem:[%s167_s11 + $0x38] sm:$0xff]  ;;  %v192_v13 = vld [vmem:[%s1028_s1] sm:$0xff]  ;;  %v666_v14 = vpack.c.bf16 %v604_v10, %v603_v8  ;;  %s515_s19 = sshll.u32 %s189_s17, 4  ;;  %s502_s16 = scalar_lea.sflag [#allocation4], %s958_s5  ;;  %s978_s19 = int_to_ptr.vmem [resolvable:$true] %s515_s19 }
  0x3c   : > { %661 = vmatpush3.bf16.msra.mxu0 %v660_v6  ;;  %v193_v15 = vld [vmem:[%s1029_s2] sm:$0xff]  ;;  %664 = vmatpush3.bf16.msra.mxu1 %v663_v9  ;;  %v669_v16 = vpack.c.bf16 %v608_v12, %v607_v11  ;;  %s756_s28 = scalar_lea.vmem %s978_s19, 512  ;;  %p1037_p11 = scmp.ne.s32.totalorder %s1034_s24, 0 }
  0x3d   : > { %665 = vmatprep.subr.bf16.mxu0 %v827_v0  ;;  %668 = vmatprep.subr.bf16.mxu1 %v827_v0  ;;  %p757_p6 = scmp.ne.s32.totalorder %s978_s19, %s756_s28  ;;  %s831_s29 = smov [#allocation5]  }
  0x3e   : > { %196 = vperm.xlu0 %725, %v193_v15   ;;  %s760_s30 = sshll.u32 %s831_s29, 4  ;;  %s761_s30 = int_to_ptr.vmem [resolvable:$false] %s760_s30 }
  0x3f   : > { %636 = vmatmul.mubr.msk.f32.vlgmr.msra.gmra.mrb[0].mxu0 %vm201_vm1, %v192_v13  ;;  %643 = vmatmul.mubr.msk.f32.vlgmr.msra.gmra.mrb[0].mxu1 %vm201_vm1, %v192_v13  ;;  %p758_p12 = pnand %p757_p6, %p1037_p11  ;;  %s762_s9 = scalar_lea.vmem %s761_s30, 1024 }
  0x40   : > { %667 = vmatpush3.bf16.msra.mxu0 %v666_v14  ;;  %670 = vmatpush3.bf16.msra.mxu1 %v669_v16  ;;  %p763_p8 = scmp.lt.s32.totalorder %s978_s19, %s761_s30  ;;  %p764_p10 = scmp.lt.s32.totalorder %s762_s9, %s756_s28 }
  0x41   : > { %649 = vmatprep.mubr.msk.f32.mxu0 %vm828_vm0, %v829_v1  ;;  %656 = vmatprep.mubr.msk.f32.mxu1 %vm828_vm0, %v829_v1  ;;  %p759_p13 = pneg %p758_p12 }
  0x42   : > { %p765_p0 = por %p764_p10, %p763_p8 }
  0x43   : > { %650 = vmatmul.mubr.msk.f32.vlgmr.msra.gmra.mrb[2].mxu0 %vm201_vm1, %v192_v13  ;;  %657 = vmatmul.mubr.msk.f32.vlgmr.msra.gmra.mrb[2].mxu1 %vm201_vm1, %v192_v13 }
  0x44   : > { %p766_p2 = pnand %p765_p0, %p759_p13 }
  0xbd   : > { %v197_v17 = vpop.permute.xlu0 %196 }
 0x112   : > { %v271_v18 = vpop.f32.mrb[0].mxu0  ;;  %v345_v19 = vpop.f32.mrb[0].mxu1 }
 0x113   : > { %v272_v20 = vadd.f32 %v271_v18, %v197_v17  ;;  %v637_v21 = vpop.f32.mrb[1].mxu0  ;;  %v346_v22 = vadd.f32 %v345_v19, %v197_v17  ;;  %v644_v23 = vpop.f32.mrb[1].mxu1 }
 0x115   : > { %275 = vst [vmem:[%s189_s17] sm:$0xff] %v272_v20  ;;  %602 = vst [vmem:[%s189_s17 + $0x8] sm:$0xff] %v346_v22 }
 0x116   : > { %v420_v24 = vpop.f32.mrb[2].mxu0  ;;  %v495_v26 = vpop.f32.mrb[2].mxu1 }
 0x117   : > { %v421_v25 = vadd.f32 %v420_v24, %v197_v17  ;;  %v651_v27 = vpop.f32.mrb[3].mxu0  ;;  %v496_v28 = vadd.f32 %v495_v26, %v197_v17  ;;  %v658_v29 = vpop.f32.mrb[3].mxu1 }
 0x119   : > { %606 = vst [vmem:[%s189_s17 + $0x10] sm:$0xff] %v421_v25  ;;  %610 = vst [vmem:[%s189_s17 + $0x18] sm:$0xff] %v496_v28 }
 0x11a   : > { %769 = shalt.err (!%p766_p2)
}
 0x11b   : > { %s770_s10 = scalar_lea.hbm %s983_s27, 512  ;;  %s774_s4 = scalar_lea.hbm %s1030_s3, 1024 }
 0x11c   : > { %p771_p4 = scmp.ne.s32.totalorder %s983_s27, %s770_s10  ;;  %p775_p9 = scmp.lt.u32.totalorder %s983_s27, %s1030_s3 }
 0x11d   : > { %p776_p1 = scmp.lt.u32.totalorder %s774_s4, %s770_s10  ;;  %p778_p6 = scmp.lt.u32.totalorder %s770_s10, %s983_s27 }
 0x11e   : > { %p772_p5 = pnand %p771_p4, %p1037_p11 }
 0x11f   : > { %p777_p3 = por %p776_p1, %p775_p9 }
 0x120   : > { %p773_p7 = pneg %p772_p5 }
 0x121   : > { %p779_p12 = por %p778_p6, %p777_p3 }
 0x123   : > { %p780_p13 = pnand %p779_p12, %p773_p7 }
 0x125   : > { %783 = shalt.err (!%p780_p13)
}
 0x126   : > { %s832_s8 = smov 128   ;;  %s833_s17 = smov 8  }
 0x127   : > { %673 = dma.vmem_to_hbm [thread:$0]  (%p1037_p11), %s978_s19, 512, %s983_s27, %s502_s16, %s832_s8, %s832_s8, %s833_s17  }
 0x128 PF: > { %s530_s20 = sand.u32 1, %s810_s12   ;;  %p1038_p8 = scmp.ne.s32.totalorder %s1035_s25, 0 }
 0x129   : > { %p1039_p10 = scmp.ge.s32.totalorder %s822_s15, 2  ;;  %s531_s22 = scalar_lea.sflag [#allocation4], %s530_s20 }
 0x12b   : > { %p680_p0 = pnand %p1039_p10, %p1038_p8 }
 0x12d   : > { %805 = dma.done.wait (!%p680_p0), %s531_s22, 512  }
 0x12e   : > { %807 = vsyncadd (!%p680_p0), %s531_s22, 4294966784  ;;  %p16_p2 = scmp.ge.s32.totalorder %s879_s18, 4   ;;  %s1040_s12 = smov %s814_s13 }
 0x12f   : > { %s1041_s13 = smov %s818_s14  ;;  %s1042_s14 = smov %s891_s21 }
 0x130   : > { %s1043_s15 = smov %s879_s18  ;;  %18 = sbr.rel (!%p16_p2) target bundleno = 5 (0x5), region = 83 }
 0x137   :  { %536 = vsyncpa [#allocation3], 1 }
 0x138   :  { %538 = vsyncpa [#allocation3 + $0x1], 1 }
 0x139   :  { %539 = vsyncpa [#allocation4], 1 }
 0x13a   :  { %541 = vsyncpa [#allocation4 + $0x1], 1 }

</bundles_post_ra>
